<compile_context>
chip_gen: v6e
topology: v6e:2x2x1
jax: 0.10.0
libtpu: 0.0.40
codegen_flags: <defaults>
</compile_context>

<pallas_src>
import functools

import jax
import jax.numpy as jnp
from jax.experimental import pallas as pl
from jax.experimental.pallas import tpu as pltpu


# < 64 MiB v7x physical VMEM per TensorCore; overrides the smaller scoped
# defaults on v5e (16 MiB) / v6e (32 MiB).
_VMEM_LIMIT_BYTES = 48 * 1024 * 1024


def _stats_pool_kernel(x_ref, mean_ref, rms_ref, sum_acc, sq_acc, *,
                       t_total, t_tile):
    t = pl.program_id(2)
    nt = pl.num_programs(2)

    @pl.when(t == 0)
    def _():
        sum_acc[...] = jnp.zeros_like(sum_acc)
        sq_acc[...] = jnp.zeros_like(sq_acc)

    # Single fused pass over the tile: accumulate sum and sum-of-squares.
    x = x_ref[...].astype(jnp.float32)            # (TB, TC, TT)

    if t_total % t_tile != 0:
        # Ragged T: only the final tile pays for the iota/compare/select mask.
        @pl.when(t != nt - 1)
        def _():
            sum_acc[...] += jnp.sum(x, axis=-1)
            sq_acc[...] += jnp.sum(x * x, axis=-1)

        @pl.when(t == nt - 1)
        def _():
            lane = jax.lax.broadcasted_iota(jnp.int32, x.shape, dimension=2)
            xm = jnp.where(t * t_tile + lane < t_total, x, 0.0)
            sum_acc[...] += jnp.sum(xm, axis=-1)
            sq_acc[...] += jnp.sum(xm * xm, axis=-1)
    else:
        sum_acc[...] += jnp.sum(x, axis=-1)       # (TB, TC)
        sq_acc[...] += jnp.sum(x * x, axis=-1)    # (TB, TC)

    @pl.when(t == nt - 1)
    def _():
        inv_t = jnp.float32(1.0 / t_total)        # global T, never the tile size
        mean_ref[...] = (sum_acc[...] * inv_t).astype(mean_ref.dtype)
        rms_ref[...] = jnp.sqrt(sq_acc[...] * inv_t).astype(rms_ref.dtype)


def _pick_tiles(B, C, T, itemsize):
    """Tile sizes legal for the (B, C, T) input and the (B, C) outputs.

    Legality: TB multiple of 8 or == B (output sublanes); TC multiple of 128
    or == C (output lanes / input sublanes); TT multiple of 128 or == T
    (input lanes).  Priority: maximize TT (the only HBM-contiguous axis),
    shrinking TC / TB before TT.
    """
    # 12 MiB (f32) / 8 MiB (sub-32-bit, leaves room for f32 cast temporaries)
    # per input tile: double-buffered pipeline + temps stay well inside the
    # 48 MiB scoped-VMEM limit on every generation.
    budget = (12 if itemsize >= 4 else 8) * 1024 * 1024

    TB = B if B <= 8 else 8
    max_elems = budget // (TB * itemsize)          # element budget per (TC, TT) slab

    if C * T <= max_elems:
        # Whole (C, T) slab fits: full T (no raggedness), single reduction step.
        TC, TT = C, T
    else:
        tc_min = C if C <= 128 else 128
        if T * tc_min <= max_elems:
            # Full T fits with the minimum channel tile: keep TT == T and give
            # the leftover budget back to TC (multiple of 128, < C here).
            TT = T
            TC = max(128, (max_elems // T) // 128 * 128)
        else:
            # Budget-bound even at the minimum channel tile: TT takes it all.
            TC = tc_min
            TT = max((max_elems // TC) // 128 * 128, min(T, 128))

    # v7x dual-TensorCore: a "parallel" grid axis only shards across the two
    # cores when it has >= 2 programs.  If B and C fit in a single tile, split
    # C (kept a multiple of 128) so both cores get work.  No-op on v5e/v6e.
    if pl.cdiv(B, TB) * pl.cdiv(C, TC) == 1 and C >= 256:
        TC = (((C + 1) // 2) + 127) // 128 * 128

    return TB, TC, TT


def stats_pooling(x, axis=2):
    """x: (B, C, T); reduction over time (axis=2). Returns (B, 2*C) = [mean | rms]."""
    assert x.ndim == 3 and axis in (2, -1), "kernel implemented for axis=2 (time)"
    B, C, T = x.shape
    TB, TC, TT = _pick_tiles(B, C, T, jnp.dtype(x.dtype).itemsize)
    nb, nc, nt = pl.cdiv(B, TB), pl.cdiv(C, TC), pl.cdiv(T, TT)

    kernel = functools.partial(_stats_pool_kernel, t_total=T, t_tile=TT)

    mean, rms = pl.pallas_call(
        kernel,
        out_shape=(jax.ShapeDtypeStruct((B, C), x.dtype),
                   jax.ShapeDtypeStruct((B, C), x.dtype)),
        grid_spec=pltpu.PrefetchScalarGridSpec(
            num_scalar_prefetch=0,
            grid=(nb, nc, nt),
            in_specs=[pl.BlockSpec((TB, TC, TT), lambda i, j, t: (i, j, t))],
            out_specs=[pl.BlockSpec((TB, TC), lambda i, j, t: (i, j)),
                       pl.BlockSpec((TB, TC), lambda i, j, t: (i, j))],
            scratch_shapes=[pltpu.VMEM((TB, TC), jnp.float32),
                            pltpu.VMEM((TB, TC), jnp.float32)],
        ),
        compiler_params=pltpu.CompilerParams(
            dimension_semantics=("parallel", "parallel", "arbitrary"),
            vmem_limit_bytes=_VMEM_LIMIT_BYTES,
        ),
    )(x)

    # torch.cat((mean, std), dim=1) done in the wrapper; the (B, 2C) result is
    # tiny relative to the streamed input, so kernel outputs stay lane-dense.
    return jnp.concatenate([mean, rms], axis=1)


if __name__ == "__main__":
    key = jax.random.PRNGKey(0)
    B, C, T = 2, 4, 16
    x = jax.random.normal(key, (B, C, T), dtype=jnp.float32)

    out = jax.block_until_ready(stats_pooling(x, axis=2))

    # Plain-JAX reference (matches the PyTorch module semantics exactly).
    mean_ref = jnp.mean(x, axis=2)
    std_ref = jnp.sqrt(jnp.mean(x * x, axis=2))  # RMS, exactly as the module computes
    ref = jnp.concatenate([mean_ref, std_ref], axis=1)

    assert out.shape == (B, 2 * C), out.shape
    assert jnp.allclose(out, ref, atol=1e-5, rtol=1e-5), "mismatch vs reference"

    print("KERNEL_OK")
</pallas_src>

<mosaic_0001>
module attributes {stable_mosaic.version = 11 : i64} {
  func.func @_stats_pool_kernel(%arg0: i32, %arg1: i32, %arg2: i32, %arg3: memref<2x4x16xf32, #tpu.memory_space<vmem>>, %arg4: memref<2x4xf32, #tpu.memory_space<vmem>>, %arg5: memref<2x4xf32, #tpu.memory_space<vmem>>, %arg6: memref<2x4xf32, #tpu.memory_space<vmem>>, %arg7: memref<2x4xf32, #tpu.memory_space<vmem>>) attributes {dimension_semantics = [#tpu.dimension_semantics<parallel>, #tpu.dimension_semantics<parallel>, #tpu.dimension_semantics<arbitrary>], iteration_bounds = array<i64: 1, 1, 1>, scalar_prefetch = 0 : i64, scratch_operands = 2 : i64, tpu.core_type = #tpu.core_type<tc>, window_params = [{transform_indices = @transform_0, window_bounds = array<i64: 2, 4, 16>}, {transform_indices = @transform_1, window_bounds = array<i64: 2, 4>}, {transform_indices = @transform_2, window_bounds = array<i64: 2, 4>}]} {
    %c0_i32 = arith.constant 0 : i32
    %0 = arith.cmpi eq, %arg2, %c0_i32 : i32
    %1 = arith.extui %0 : i1 to i32
    %c0_i32_0 = arith.constant 0 : i32
    %2 = arith.cmpi ne, %1, %c0_i32_0 : i32
    scf.if %2 {
      %cst_14 = arith.constant 0.000000e+00 : f32
      %16 = vector.broadcast %cst_14 : f32 to vector<2x4xf32>
      %c0_15 = arith.constant 0 : index
      %c0_16 = arith.constant 0 : index
      %17 = vector.load %arg6[%c0_15, %c0_16] : memref<2x4xf32, #tpu.memory_space<vmem>>, vector<2x4xf32>
      tpu.vector_store %arg6[%c0_15, %c0_16], %16 {strides = array<i32>} : memref<2x4xf32, #tpu.memory_space<vmem>>, vector<2x4xf32>,
      %cst_17 = arith.constant 0.000000e+00 : f32
      %18 = vector.broadcast %cst_17 : f32 to vector<2x4xf32>
      %c0_18 = arith.constant 0 : index
      %c0_19 = arith.constant 0 : index
      %19 = vector.load %arg7[%c0_18, %c0_19] : memref<2x4xf32, #tpu.memory_space<vmem>>, vector<2x4xf32>
      tpu.vector_store %arg7[%c0_18, %c0_19], %18 {strides = array<i32>} : memref<2x4xf32, #tpu.memory_space<vmem>>, vector<2x4xf32>,
    } else {
    }
    %c0 = arith.constant 0 : index
    %c0_1 = arith.constant 0 : index
    %c0_2 = arith.constant 0 : index
    %3 = vector.load %arg3[%c0, %c0_1, %c0_2] : memref<2x4x16xf32, #tpu.memory_space<vmem>>, vector<2x4x16xf32>
    %c0_3 = arith.constant 0 : index
    %c0_4 = arith.constant 0 : index
    %4 = vector.load %arg6[%c0_3, %c0_4] : memref<2x4xf32, #tpu.memory_space<vmem>>, vector<2x4xf32>
    %cst = arith.constant dense<0.000000e+00> : vector<2x4xf32>
    %5 = vector.multi_reduction <add>, %3, %cst [2] : vector<2x4x16xf32> to vector<2x4xf32>
    %6 = arith.addf %4, %5 : vector<2x4xf32>
    %c0_5 = arith.constant 0 : index
    %c0_6 = arith.constant 0 : index
    %7 = vector.load %arg6[%c0_5, %c0_6] : memref<2x4xf32, #tpu.memory_space<vmem>>, vector<2x4xf32>
    tpu.vector_store %arg6[%c0_5, %c0_6], %6 {strides = array<i32>} : memref<2x4xf32, #tpu.memory_space<vmem>>, vector<2x4xf32>,
    %c0_7 = arith.constant 0 : index
    %c0_8 = arith.constant 0 : index
    %8 = vector.load %arg7[%c0_7, %c0_8] : memref<2x4xf32, #tpu.memory_space<vmem>>, vector<2x4xf32>
    %9 = arith.mulf %3, %3 : vector<2x4x16xf32>
    %cst_9 = arith.constant dense<0.000000e+00> : vector<2x4xf32>
    %10 = vector.multi_reduction <add>, %9, %cst_9 [2] : vector<2x4x16xf32> to vector<2x4xf32>
    %11 = arith.addf %8, %10 : vector<2x4xf32>
    %c0_10 = arith.constant 0 : index
    %c0_11 = arith.constant 0 : index
    %12 = vector.load %arg7[%c0_10, %c0_11] : memref<2x4xf32, #tpu.memory_space<vmem>>, vector<2x4xf32>
    tpu.vector_store %arg7[%c0_10, %c0_11], %11 {strides = array<i32>} : memref<2x4xf32, #tpu.memory_space<vmem>>, vector<2x4xf32>,
    %c0_i32_12 = arith.constant 0 : i32
    %13 = arith.cmpi eq, %arg2, %c0_i32_12 : i32
    %14 = arith.extui %13 : i1 to i32
    %c0_i32_13 = arith.constant 0 : i32
    %15 = arith.cmpi ne, %14, %c0_i32_13 : i32
    scf.if %15 {
      %c0_14 = arith.constant 0 : index
      %c0_15 = arith.constant 0 : index
      %16 = vector.load %arg6[%c0_14, %c0_15] : memref<2x4xf32, #tpu.memory_space<vmem>>, vector<2x4xf32>
      %cst_16 = arith.constant 6.250000e-02 : f32
      %17 = vector.broadcast %cst_16 : f32 to vector<2x4xf32>
      %18 = arith.mulf %16, %17 : vector<2x4xf32>
      %c0_17 = arith.constant 0 : index
      %c0_18 = arith.constant 0 : index
      %19 = vector.load %arg4[%c0_17, %c0_18] : memref<2x4xf32, #tpu.memory_space<vmem>>, vector<2x4xf32>
      tpu.vector_store %arg4[%c0_17, %c0_18], %18 {strides = array<i32>} : memref<2x4xf32, #tpu.memory_space<vmem>>, vector<2x4xf32>,
      %c0_19 = arith.constant 0 : index
      %c0_20 = arith.constant 0 : index
      %20 = vector.load %arg7[%c0_19, %c0_20] : memref<2x4xf32, #tpu.memory_space<vmem>>, vector<2x4xf32>
      %cst_21 = arith.constant 6.250000e-02 : f32
      %21 = vector.broadcast %cst_21 : f32 to vector<2x4xf32>
      %22 = arith.mulf %20, %21 : vector<2x4xf32>
      %23 = math.sqrt %22 : vector<2x4xf32>
      %c0_22 = arith.constant 0 : index
      %c0_23 = arith.constant 0 : index
      %24 = vector.load %arg5[%c0_22, %c0_23] : memref<2x4xf32, #tpu.memory_space<vmem>>, vector<2x4xf32>
      tpu.vector_store %arg5[%c0_22, %c0_23], %23 {strides = array<i32>} : memref<2x4xf32, #tpu.memory_space<vmem>>, vector<2x4xf32>,
    } else {
    }
    return
  }
  func.func @transform_0(%arg0: i32, %arg1: i32, %arg2: i32) -> (i32, i32, i32) {
    %c0_i32 = arith.constant 0 : i32
    return %arg0, %arg1, %arg2 : i32, i32, i32
  }
  func.func @transform_1(%arg0: i32, %arg1: i32, %arg2: i32) -> (i32, i32) {
    %c0_i32 = arith.constant 0 : i32
    return %arg0, %arg1 : i32, i32
  }
  func.func @transform_2(%arg0: i32, %arg1: i32, %arg2: i32) -> (i32, i32) {
    %c0_i32 = arith.constant 0 : i32
    return %arg0, %arg1 : i32, i32
  }
}

</mosaic_0001>

<bundles_post_ra>
// kernel: tpu_custom_call.1
= control target key start
LH: loop header
LB: loop body
LE: loop exit
PB: predicated region body
PF: predicated region fallthrough
CT: control target
= control target key end

     0   :  { %8 = vsyncpa [#allocation5], 0  ;;  %s239_s0 = inlined_call_operand.hbm [shape: f32[2,4,16], index: 0, kind: input, shape index: {}]   ;;  %s240_s1 = inlined_call_operand.hbm [shape: f32[2,4], index: 1, kind: output, shape index: {0}]   ;;  %s241_s2 = inlined_call_operand.hbm [shape: f32[2,4], index: 2, kind: output, shape index: {1}]  }
   0x1   :  { %9 = vsyncpa [#allocation6], 0 }
   0x2   :  { %10 = vsyncpa [#allocation9], 0  ;;  %s203_s9 = smov [#allocation4]  }
   0x3   :  { %s16_s10 = sshll.u32 %s203_s9, 4  ;;  %s17_s10 = int_to_ptr.vmem [resolvable:$true] %s16_s10 }
   0x4   :  { %s145_s11 = scalar_lea.vmem %s17_s10, 128  ;;  %p150_p1 = scmp.lt.s32.totalorder %s17_s10, %s17_s10 }
   0x5   :  { %p146_p0 = scmp.ne.s32.totalorder %s17_s10, %s145_s11  ;;  %p151_p2 = scmp.lt.s32.totalorder %s145_s11, %s145_s11 }
   0x7   :  { %p152_p3 = por %p151_p2, %p150_p1 }
   0x9   :  { %p153_p4 = pnand %p152_p3, %p146_p0 }
   0xb   :  { %156 = shalt.err (!%p153_p4)
}
   0xc   :  { %s204_s12 = smov 64   ;;  %s205_s13 = smov 4  }
   0xd   :  { %22 = dma.hbm_to_vmem [thread:$0]  %s239_s0, 128, %s17_s10, [#allocation5], %s204_s12, %s204_s12, %s205_s13  }
   0xe   :  { %197 = dma.done.wait [#allocation5], 128  }
   0xf   :  { %198 = vsyncadd [#allocation5], 4294967168  ;;  %v33_v0 = vld [vmem:[#allocation4] sm:$0xf]  ;;  %vm36_vm0 = vcmask 125952   ;;  %vm30_vm1 = vcmask 25600   ;;  %v45_v9 = vlaneseq }
  0x10   :  { %v34_v1 = vld [vmem:[#allocation4 + $0x4] sm:$0xf]  ;;  %v62_v2 = vmul.f32 %v33_v0, %v33_v0  ;;  %v37_v4 = vsel %vm36_vm0, %v33_v0, 0.0  ;;  %v206_v8 = vmov 0.0   ;;  %vm55_vm2 = vcmask 1041409   ;;  %s207_s0 = smov [#allocation7]  }
  0x11   :  { %v63_v3 = vmul.f32 %v34_v1, %v34_v1  ;;  %38 = vadd.xlane.f32.xlu1 %v37_v4  ;;  %v40_v6 = vsel %vm36_vm0, %v34_v1, 0.0  ;;  %32 = vst.msk [vmem:[#allocation3] sm:$0x3] %vm30_vm1, %v206_v8  ;;  %31 = vst.msk [vmem:[#allocation2] sm:$0x3] %vm30_vm1, %v206_v8  ;;  %v46_v10 = vand.u32 127, %v45_v9 }
  0x12   :  { %v64_v5 = vsel %vm36_vm0, %v62_v2, 0.0  ;;  %v48_v11 = vshrl.u32 %v45_v9, 7  ;;  %s106_s16 = sshll.u32 %s207_s0, 4  ;;  %s107_s16 = int_to_ptr.vmem [resolvable:$true] %s106_s16 }
  0x13   :  { %65 = vadd.xlane.f32.xlu0 %v64_v5  ;;  %v67_v7 = vsel %vm36_vm0, %v63_v3, 0.0  ;;  %s157_s17 = scalar_lea.vmem %s107_s16, 32  ;;  %p162_p6 = scmp.lt.s32.totalorder %s107_s16, %s107_s16 }
  0x14   :  { %v49_v13 = vsub.s32 %v46_v10, %v48_v11  ;;  %p158_p5 = scmp.ne.s32.totalorder %s107_s16, %s157_s17  ;;  %p163_p7 = scmp.lt.s32.totalorder %s157_s17, %s157_s17 }
  0x15   :  { %41 = vadd.xlane.f32.xlu1 %v40_v6 }
  0x16   :  { %p164_p8 = por %p163_p7, %p162_p6 }
  0x17   :  { %68 = vadd.xlane.f32.xlu0 %v67_v7 }
  0x18   :  { %v35_v17 = vld [vmem:[#allocation2] sm:$0x3]  ;;  %v61_v21 = vld [vmem:[#allocation3] sm:$0x3]  ;;  %p165_p9 = pnand %p164_p8, %p158_p5 }
  0x9a   :  { %v39_v12 = vpop.xlane.xlu1 %38 }
  0x9b   :  { %v50_v15 = vrot.slane %v39_v12, %v49_v13 }
  0x9c   :  { %v66_v14 = vpop.xlane.xlu0 %65 }
  0x9d   :  { %v75_v20 = vrot.slane %v66_v14, %v49_v13 }
  0x9e   :  { %v42_v16 = vpop.xlane.xlu1 %41 }
  0x9f   :  { %v54_v18 = vrot.slane %v42_v16, %v49_v13 }
  0xa0   :  { %v69_v19 = vpop.xlane.xlu0 %68 }
  0xa1   :  { %v79_v22 = vrot.slane %v69_v19, %v49_v13  ;;  %v56_v23 = vsel %vm55_vm2, %v54_v18, %v50_v15 }
  0xa2   :  { %v58_v24 = vadd.f32 %v56_v23, %v35_v17 }
  0xa3   :  { %v80_v25 = vsel %vm55_vm2, %v79_v22, %v75_v20 }
  0xa4   :  { %v82_v26 = vadd.f32 %v80_v25, %v61_v21  ;;  %60 = vst.msk [vmem:[#allocation2] sm:$0x3] %vm30_vm1, %v58_v24 }
  0xa6   :  { %83 = vst.msk [vmem:[#allocation3] sm:$0x3] %vm30_vm1, %v82_v26 }
  0xab   :  { %v87_v27 = vld [vmem:[#allocation2] sm:$0x3] }
  0xac   :  { %v88_v28 = vmul.f32 0.0625, %v87_v27 }
  0xad   :  { %v90_v29 = vld [vmem:[#allocation3] sm:$0x3] }
  0xae   :  { %89 = vst.msk [vmem:[#allocation7] sm:$0x3] %vm30_vm1, %v88_v28  ;;  %v91_v30 = vmul.f32 0.0625, %v90_v29 }
  0xaf   :  { %168 = shalt.err (!%p165_p9)
}
  0xb0   :  { %109 = dma.vmem_to_hbm [thread:$0]  %s107_s16, 32, %s240_s1, [#allocation6]   ;;  %135 = vrsqrt.f32 %v91_v30  ;;  %vm94_vm3 = vcmp.eq.f32.partialorder %v91_v30, inf  ;;  %v97_v33 = vand.u32 2147483648, %v91_v30  ;;  %vm96_vm4 = vcmp.eq.f32.partialorder %v91_v30, 0.0 }
  0xb1   :  { %s208_s20 = smov [#allocation8]  }
  0xb2   :  { %s116_s21 = sshll.u32 %s208_s20, 4  ;;  %s117_s21 = int_to_ptr.vmem [resolvable:$true] %s116_s21 }
  0xb3   :  { %s177_s22 = scalar_lea.vmem %s117_s21, 32  ;;  %p182_p11 = scmp.lt.s32.totalorder %s117_s21, %s117_s21 }
  0xb4   :  { %p178_p10 = scmp.ne.s32.totalorder %s117_s21, %s177_s22  ;;  %p183_p12 = scmp.lt.s32.totalorder %s177_s22, %s177_s22 }
  0xb6   :  { %p184_p13 = por %p183_p12, %p182_p11 }
  0xb8   :  { %p185_p0 = pnand %p184_p13, %p178_p10 }
  0xbd   :  { %v136_v31 = vpop.eup %135 }
  0xbe   :  { %v93_v32 = vmul.f32 %v136_v31, %v91_v30 }
  0xc0   :  { %v95_v34 = vsel %vm94_vm3, %v91_v30, %v93_v32 }
  0xc1   :  { %v98_v35 = vsel %vm96_vm4, %v97_v33, %v95_v34 }
  0xc2   :  { %99 = vst.msk [vmem:[#allocation8] sm:$0x3] %vm30_vm1, %v98_v35 }
  0xc3   :  { %188 = shalt.err (!%p185_p0)
}
  0xc4   :  { %119 = dma.vmem_to_hbm [thread:$0]  %s117_s21, 32, %s241_s2, [#allocation9]  }
  0xc5   :  { %199 = dma.done.wait [#allocation6], 32  }
  0xc6   :  { %200 = vsyncadd [#allocation6], 4294967264 }
  0xc7   :  { %201 = dma.done.wait [#allocation9], 32  }
  0xc8   :  { %202 = vsyncadd [#allocation9], 4294967264 }
  0xc9   :  { %126 = vsyncpa [#allocation5], 1 }
  0xca   :  { %127 = vsyncpa [#allocation6], 1 }
  0xcb   :  { %128 = vsyncpa [#allocation9], 1 }

</bundles_post_ra>
